<compile_context>
chip_gen: v7x
topology: tpu7x:2x2x1
jax: 0.10.0
libtpu: 0.0.40
codegen_flags: <defaults>
</compile_context>

<pallas_src>
import functools
import math

import jax
import jax.numpy as jnp
from jax.experimental import pallas as pl
from jax.experimental.pallas import tpu as pltpu


# --------------------------------------------------------------------------
# tiling / layout helpers (wrapper side, tiny XLA ops only)
# --------------------------------------------------------------------------

def _pick_col_tile(hw, batch, target=512):
    """Lane tile over the pixel axis: a multiple of 128 dividing hw (or hw itself)."""
    if hw % 128 != 0:
        # TODO(synk): pad the pixel axis to a multiple of 128 for odd spatial sizes.
        return hw
    tn = 128
    while tn * 2 <= min(hw, target) and hw % (tn * 2) == 0:
        tn *= 2
    # keep >= 2 total grid blocks so the "parallel" axes can use both v7x TensorCores
    if batch * (hw // tn) < 2 and tn > 128 and hw % (tn // 2) == 0:
        tn //= 2
    return tn


def _build_stage_mats(ps_params, C):
    """Fold PixelShuffle(2) into each stage's 1x1-conv weight.

    Activations are channel-major with row index = class * G + group, where `group`
    enumerates the sub-pixel positions produced by previous PixelShuffle stages.
    Stage s (conv C->4C, ReLU, PixelShuffle(2)) becomes the dense map
        h_out = A_s @ h_in + bias_s          A_s: (C*4G, C*G)
    and its input gradient is A_s^T @ g.  Both orientations are returned (both tiny).
    """
    fwd, bwd, biases = [], [], []
    G = 1
    for (Wi, bi) in ps_params:
        # Wi: (C, 4C); column k = class_out*4 + (i*2+j)  (PyTorch pixel-shuffle order)
        Wr = Wi.reshape(C, C, 4)                               # [c_in, c_out, ij]
        eye = jnp.eye(G, dtype=Wi.dtype)
        # M[(c_in, g), (c_out, g2, ij)] = Wr[c_in, c_out, ij] * I[g, g2]
        M = jnp.einsum("cdk,gh->cgdhk", Wr, eye).reshape(C * G, C * 4 * G)
        br = bi.reshape(C, 4)                                  # [c_out, ij]
        bias = jnp.broadcast_to(br[:, None, :], (C, G, 4)).reshape(C * 4 * G, 1)
        fwd.append(jnp.transpose(M))                           # forward LHS (out, in)
        bwd.append(M)                                          # backward LHS (in, out)
        biases.append(bias)
        G *= 4
    return fwd, bwd, biases


def _grouped_to_nchw(y, n_stages, C, H, W):
    """(B, C*4^n, H*W) grouped logits -> (B, C, H*2^n, W*2^n) (PixelShuffle semantics)."""
    # TODO(synk): for very large outputs, fold this re-layout into the final kernel by
    # tiling over coarse rows and writing (1, C, r, W*r) NCHW slabs directly.
    B = y.shape[0]
    r = 2 ** n_stages
    y = y.reshape((B, C) + (2, 2) * n_stages + (H, W))
    i_axes = [2 + 2 * s for s in range(n_stages)]
    j_axes = [3 + 2 * s for s in range(n_stages)]
    h_ax = 2 + 2 * n_stages
    w_ax = h_ax + 1
    y = jnp.transpose(y, [0, 1, h_ax] + i_axes + [w_ax] + j_axes)
    return y.reshape(B, C, H * r, W * r)


# --------------------------------------------------------------------------
# in-kernel helpers (operate on values, traced inside the Pallas kernels)
# --------------------------------------------------------------------------

def _forward_chain(x, w0t, fwd_mats, biases):
    """Fused decoder forward on a (channels, pixels) tile; returns logits + ReLU acts."""
    # NOTE: for large conv_in_ch, cast x / w0t to bf16 here (keep f32 accumulation)
    # to use the bf16 MXU path on v5e/v6e; kept f32 for exact semantics at demo size.
    h = jnp.dot(w0t, x, preferred_element_type=jnp.float32)     # 1x1 conv, no bias
    acts = []
    for A, b in zip(fwd_mats, biases):
        h = jnp.maximum(jnp.dot(A, h, preferred_element_type=jnp.float32) + b, 0.0)
        acts.append(h)
    return h, acts


def _grouped_softmax(z, C, Gf):
    """Softmax over the C classes; rows of z are class-major chunks of Gf groups."""
    chunks = [z[c * Gf:(c + 1) * Gf, :] for c in range(C)]
    m = chunks[0]
    for c in chunks[1:]:
        m = jnp.maximum(m, c)
    es = [jnp.exp(c - m) for c in chunks]
    s = es[0]
    for e in es[1:]:
        s = s + e
    inv = pl.reciprocal(s, approx=True)          # EUP slot, effectively free
    return [e * inv for e in es]                 # list of (Gf, tn) chunks


# --------------------------------------------------------------------------
# Pallas kernels
# --------------------------------------------------------------------------

def _decoder_fwd_kernel(x_ref, d_ref, scale_ref, *refs, n_stages):
    """out = decoder(x + scale_b * d), fully fused (pixel-shuffle folded into weights)."""
    w0t = refs[0][...]
    fwd = [refs[1 + i][...] for i in range(n_stages)]
    bias = [refs[1 + n_stages + i][...] for i in range(n_stages)]
    out_ref = refs[1 + 2 * n_stages]

    xp = x_ref[0] + d_ref[0] * scale_ref[0]                 # (Cin, tn); scale is (1, 1)
    h, _ = _forward_chain(xp, w0t, fwd, bias)
    out_ref[0] = h.astype(out_ref.dtype)


def _vat_grad_kernel(x_ref, d_ref, scale_ref, *refs, n_stages, C, Gf, inv_batch):
    """One fused VAT power-iteration step for a tile of pixels.

    pred   = softmax(decoder(x))         (recomputed in-kernel, never hits HBM)
    logits = decoder(x + scale_b * d)
    g      = d KL(pred || softmax(logits)) / d logits   (reduction='batchmean')
    grad   = full backward of g to the decoder input (ReLU masks from in-register acts)
    ssq    = per-pixel-column sum of grad^2 (fused l2-norm partials for the next scale)
    """
    w0t = refs[0][...]
    w0 = refs[1][...]
    fwd = [refs[2 + i][...] for i in range(n_stages)]
    bwd = [refs[2 + n_stages + i] for i in range(n_stages)]
    bias = [refs[2 + 2 * n_stages + i][...] for i in range(n_stages)]
    grad_ref = refs[2 + 3 * n_stages]
    ssq_ref = refs[2 + 3 * n_stages + 1]

    x = x_ref[0]                                            # (Cin, tn)

    # unperturbed forward -> pred (stays in VMEM/registers)
    logits0, _ = _forward_chain(x, w0t, fwd, bias)
    pred = _grouped_softmax(logits0, C, Gf)

    # perturbed forward
    xp = x + d_ref[0] * scale_ref[0]
    logits, acts = _forward_chain(xp, w0t, fwd, bias)
    sm = _grouped_softmax(logits, C, Gf)

    # d/d(logits) of KL(pred || softmax(logits)) with 'batchmean'
    g = jnp.concatenate([(s - p) * inv_batch for s, p in zip(sm, pred)], axis=0)

    # backward through the fused decoder
    for s in range(n_stages - 1, -1, -1):
        g = jnp.where(acts[s] > 0.0, g, 0.0)                # ReLU mask, recomputed
        g = jnp.dot(bwd[s][...], g, preferred_element_type=jnp.float32)
    gx = jnp.dot(w0, g, preferred_element_type=jnp.float32)  # (Cin, tn)
    grad_ref[0] = gx.astype(grad_ref.dtype)

    # fused l2-norm partials: sublane-reduce only, lane-dense (1, 1, tn) store
    col = jnp.sum(gx * gx, axis=0, keepdims=True)            # (1, tn)
    ssq_ref[...] = col[None].astype(ssq_ref.dtype)           # (1, 1, tn)


# --------------------------------------------------------------------------
# pallas_call wrappers
# --------------------------------------------------------------------------

def _const_spec(a):
    return pl.BlockSpec(a.shape, lambda b, j: (0, 0))


def _decoder_call(x, d, scale, w0t, fwd_mats, biases, tn):
    B, Cin, HW = x.shape
    C = w0t.shape[0]
    n_stages = len(fwd_mats)
    Dout = C * (4 ** n_stages)
    grid = (B, HW // tn)
    io_spec = pl.BlockSpec((1, Cin, tn), lambda b, j: (b, 0, j))
    weights = [w0t] + list(fwd_mats) + list(biases)
    return pl.pallas_call(
        functools.partial(_decoder_fwd_kernel, n_stages=n_stages),
        out_shape=jax.ShapeDtypeStruct((B, Dout, HW), x.dtype),
        grid_spec=pltpu.PrefetchScalarGridSpec(
            num_scalar_prefetch=0,
            grid=grid,
            in_specs=[io_spec, io_spec,
                      pl.BlockSpec((1, 1, 1), lambda b, j: (b, 0, 0))]
                     + [_const_spec(a) for a in weights],
            out_specs=pl.BlockSpec((1, Dout, tn), lambda b, j: (b, 0, j)),
        ),
        compiler_params=pltpu.CompilerParams(
            dimension_semantics=("parallel", "parallel")),
    )(x, d, scale, *weights)


def _vat_grad_call(x, d, scale, w0t, w0, fwd_mats, bwd_mats, biases, inv_batch, tn):
    B, Cin, HW = x.shape
    C = w0t.shape[0]
    n_stages = len(fwd_mats)
    Gf = 4 ** n_stages
    grid = (B, HW // tn)
    io_spec = pl.BlockSpec((1, Cin, tn), lambda b, j: (b, 0, j))
    ssq_spec = pl.BlockSpec((1, 1, tn), lambda b, j: (b, 0, j))
    weights = [w0t, w0] + list(fwd_mats) + list(bwd_mats) + list(biases)
    return pl.pallas_call(
        functools.partial(_vat_grad_kernel, n_stages=n_stages, C=C, Gf=Gf,
                          inv_batch=inv_batch),
        out_shape=(jax.ShapeDtypeStruct((B, Cin, HW), x.dtype),
                   jax.ShapeDtypeStruct((B, 1, HW), jnp.float32)),
        grid_spec=pltpu.PrefetchScalarGridSpec(
            num_scalar_prefetch=0,
            grid=grid,
            in_specs=[io_spec, io_spec,
                      pl.BlockSpec((1, 1, 1), lambda b, j: (b, 0, 0))]
                     + [_const_spec(a) for a in weights],
            out_specs=(io_spec, ssq_spec),
        ),
        compiler_params=pltpu.CompilerParams(
            dimension_semantics=("parallel", "parallel")),
    )(x, d, scale, *weights)


# --------------------------------------------------------------------------
# VATDecoder forward
# --------------------------------------------------------------------------

def vat_decoder_forward(x_nchw, _unused, params, key, *, xi=0.1, eps=10.0, it=1):
    """Forward of VATDecoder: r_adv via VAT power iteration, then upsample(x + r_adv)."""
    B, Cin, H, W = x_nchw.shape
    HW = H * W
    w0 = params["w0"]                                # (Cin, C)
    C = w0.shape[1]
    n_stages = len(params["ps"])

    x = x_nchw.reshape(B, Cin, HW)                   # channel-major view of NCHW (free)
    w0t = jnp.transpose(w0)                          # both orientations are used
    fwd_mats, bwd_mats, biases = _build_stage_mats(params["ps"], C)
    tn = _pick_col_tile(HW, B)

    def scale_from_ssq(ssq, coeff):
        # coeff * l2_normalize(v) is applied inside the kernels as coeff / (||v||_b + 1e-8)
        return (coeff / (jnp.sqrt(ssq) + 1e-8)).reshape(B, 1, 1).astype(x.dtype)

    # random perturbation (kept un-normalised; the per-batch scale folds into the kernels)
    d = jax.random.uniform(key, x.shape, dtype=x.dtype) - 0.5
    ssq = jnp.sum(d * d, axis=(1, 2))                # only HBM-sized norm pass left

    for _ in range(it):
        # fused: pred forward + perturbed forward + KL grad + full backward + grad-norm
        # partials, all in one kernel.  d(KL)/d(d) = xi * d(KL)/d(x_pert); the xi factor
        # cancels under l2-normalisation so it is dropped.
        d, col_ssq = _vat_grad_call(x, d, scale_from_ssq(ssq, xi), w0t, w0,
                                    fwd_mats, bwd_mats, biases, 1.0 / float(B), tn)
        ssq = jnp.sum(col_ssq, axis=(1, 2))          # tiny (B, HW) reduce; d not re-read

    # final pass: decoder(x + eps * l2_normalize(d)), pixel-shuffle folded into weights
    logits = _decoder_call(x, d, scale_from_ssq(ssq, eps), w0t, fwd_mats, biases, tn)
    return _grouped_to_nchw(logits, n_stages, C, H, W)        # NCHW output


def decoder_forward_nchw(x_nchw, params):
    """Plain fused decoder forward (no perturbation); used for the self-check."""
    B, Cin, H, W = x_nchw.shape
    C = params["w0"].shape[1]
    n_stages = len(params["ps"])
    x = x_nchw.reshape(B, Cin, H * W)
    w0t = jnp.transpose(params["w0"])
    fwd_mats, _, biases = _build_stage_mats(params["ps"], C)
    tn = _pick_col_tile(H * W, B)
    logits = _decoder_call(x, jnp.zeros_like(x), jnp.zeros((B, 1, 1), x.dtype),
                           w0t, fwd_mats, biases, tn)
    return _grouped_to_nchw(logits, n_stages, C, H, W)


def decoder_forward_ref(x_nchw, params):
    """Pure-XLA reference: 1x1 convs as einsum + PyTorch-semantics PixelShuffle(2)."""
    y = jnp.einsum("bchw,cd->bdhw", x_nchw, params["w0"])
    for (Wi, bi) in params["ps"]:
        y = jnp.einsum("bchw,ck->bkhw", y, Wi) + bi[None, :, None, None]
        y = jnp.maximum(y, 0.0)
        B, K, Hc, Wc = y.shape
        Cc = K // 4
        y = y.reshape(B, Cc, 2, 2, Hc, Wc)
        y = jnp.transpose(y, (0, 1, 4, 2, 5, 3))
        y = y.reshape(B, Cc, Hc * 2, Wc * 2)
    return y


# --------------------------------------------------------------------------
# parameter init (mirrors kaiming + ICNR of the PyTorch module)
# --------------------------------------------------------------------------

def init_params(key, conv_in_ch, num_classes, upscale):
    n_ps = int(math.log(upscale, 2))
    keys = jax.random.split(key, 1 + 2 * n_ps) if n_ps > 0 else [key]
    w0 = jax.random.normal(keys[0], (conv_in_ch, num_classes), jnp.float32) \
        * math.sqrt(2.0 / conv_in_ch)
    ps = []
    for i in range(n_ps):
        # ICNR: one (C, C) base kernel replicated across the 4 sub-pixel outputs
        base = jax.random.normal(keys[1 + 2 * i], (num_classes, num_classes),
                                 jnp.float32) * math.sqrt(2.0 / num_classes)
        wi = jnp.repeat(base, 4, axis=1)                      # (C, 4C)
        bound = 1.0 / math.sqrt(num_classes)
        bi = jax.random.uniform(keys[2 + 2 * i], (num_classes * 4,),
                                jnp.float32, -bound, bound)
        ps.append((wi, bi))
    return {"w0": w0, "ps": ps}


if __name__ == "__main__":
    B, Cin, H, W = 2, 8, 16, 16
    num_classes, upscale = 4, 4

    root = jax.random.PRNGKey(0)
    kp, kx, kd = jax.random.split(root, 3)
    params = init_params(kp, Cin, num_classes, upscale)
    x = jax.random.normal(kx, (B, Cin, H, W), jnp.float32)    # NCHW, like PyTorch

    # self-check: fused (pixel-shuffle-folded) decoder matches a plain XLA reference
    y_ker = jax.jit(decoder_forward_nchw)(x, params)
    y_ref = decoder_forward_ref(x, params)
    y_ker, y_ref = jax.block_until_ready((y_ker, y_ref))
    assert y_ker.shape == y_ref.shape, (y_ker.shape, y_ref.shape)
    assert bool(jnp.allclose(y_ker, y_ref, atol=1e-4, rtol=1e-4)), \
        float(jnp.max(jnp.abs(y_ker - y_ref)))

    fwd = jax.jit(functools.partial(vat_decoder_forward, xi=0.1, eps=10.0, it=1))
    out = fwd(x, None, params, kd)
    out = jax.block_until_ready(out)

    expected = (B, num_classes, H * upscale, W * upscale)
    assert out.shape == expected, (out.shape, expected)
    assert bool(jnp.all(jnp.isfinite(out)))
    print("KERNEL_OK")
</pallas_src>

<mosaic_0001>
module attributes {stable_mosaic.version = 11 : i64} {
  func.func @_decoder_fwd_kernel(%arg0: i32, %arg1: i32, %arg2: memref<1x8x256xf32, #tpu.memory_space<vmem>>, %arg3: memref<1x8x256xf32, #tpu.memory_space<vmem>>, %arg4: memref<1x1x1xf32, #tpu.memory_space<vmem>>, %arg5: memref<4x8xf32, #tpu.memory_space<vmem>>, %arg6: memref<16x4xf32, #tpu.memory_space<vmem>>, %arg7: memref<64x16xf32, #tpu.memory_space<vmem>>, %arg8: memref<16x1xf32, #tpu.memory_space<vmem>>, %arg9: memref<64x1xf32, #tpu.memory_space<vmem>>, %arg10: memref<1x64x256xf32, #tpu.memory_space<vmem>>) attributes {dimension_semantics = [#tpu.dimension_semantics<parallel>, #tpu.dimension_semantics<parallel>], iteration_bounds = array<i64: 2, 1>, scalar_prefetch = 0 : i64, scratch_operands = 0 : i64, tpu.core_type = #tpu.core_type<tc>, window_params = [{transform_indices = @transform_0, window_bounds = array<i64: 1, 8, 256>}, {transform_indices = @transform_1, window_bounds = array<i64: 1, 8, 256>}, {transform_indices = @transform_2, window_bounds = array<i64: 1, 1, 1>}, {pipeline_mode = #tpu.pipeline_mode<synchronous>, transform_indices = @transform_3, window_bounds = array<i64: 4, 8>}, {pipeline_mode = #tpu.pipeline_mode<synchronous>, transform_indices = @transform_4, window_bounds = array<i64: 16, 4>}, {pipeline_mode = #tpu.pipeline_mode<synchronous>, transform_indices = @transform_5, window_bounds = array<i64: 64, 16>}, {pipeline_mode = #tpu.pipeline_mode<synchronous>, transform_indices = @transform_6, window_bounds = array<i64: 16, 1>}, {pipeline_mode = #tpu.pipeline_mode<synchronous>, transform_indices = @transform_7, window_bounds = array<i64: 64, 1>}, {transform_indices = @transform_8, window_bounds = array<i64: 1, 64, 256>}]} {
    %c0 = arith.constant 0 : index
    %c0_0 = arith.constant 0 : index
    %0 = vector.load %arg5[%c0, %c0_0] : memref<4x8xf32, #tpu.memory_space<vmem>>, vector<4x8xf32>
    %c0_1 = arith.constant 0 : index
    %c0_2 = arith.constant 0 : index
    %1 = vector.load %arg6[%c0_1, %c0_2] : memref<16x4xf32, #tpu.memory_space<vmem>>, vector<16x4xf32>
    %c0_3 = arith.constant 0 : index
    %c0_4 = arith.constant 0 : index
    %2 = vector.load %arg7[%c0_3, %c0_4] : memref<64x16xf32, #tpu.memory_space<vmem>>, vector<64x16xf32>
    %c0_5 = arith.constant 0 : index
    %c0_6 = arith.constant 0 : index
    %3 = vector.load %arg8[%c0_5, %c0_6] : memref<16x1xf32, #tpu.memory_space<vmem>>, vector<16x1xf32>
    %c0_7 = arith.constant 0 : index
    %c0_8 = arith.constant 0 : index
    %4 = vector.load %arg9[%c0_7, %c0_8] : memref<64x1xf32, #tpu.memory_space<vmem>>, vector<64x1xf32>
    %c0_9 = arith.constant 0 : index
    %c0_10 = arith.constant 0 : index
    %c0_11 = arith.constant 0 : index
    %5 = vector.load %arg2[%c0_9, %c0_10, %c0_11] : memref<1x8x256xf32, #tpu.memory_space<vmem>>, vector<1x8x256xf32>
    %6 = vector.shape_cast %5 : vector<1x8x256xf32> to vector<8x256xf32>
    %c0_12 = arith.constant 0 : index
    %c0_13 = arith.constant 0 : index
    %c0_14 = arith.constant 0 : index
    %7 = vector.load %arg3[%c0_12, %c0_13, %c0_14] : memref<1x8x256xf32, #tpu.memory_space<vmem>>, vector<1x8x256xf32>
    %8 = vector.shape_cast %7 : vector<1x8x256xf32> to vector<8x256xf32>
    %c0_15 = arith.constant 0 : index
    %c0_16 = arith.constant 0 : index
    %c0_17 = arith.constant 0 : index
    %9 = vector.load %arg4[%c0_15, %c0_16, %c0_17] : memref<1x1x1xf32, #tpu.memory_space<vmem>>, vector<1x1x1xf32>
    %10 = vector.shape_cast %9 : vector<1x1x1xf32> to vector<1x1xf32>
    %11 = vector.broadcast %10 : vector<1x1xf32> to vector<8x256xf32>
    %12 = arith.mulf %8, %11 : vector<8x256xf32>
    %13 = arith.addf %6, %12 : vector<8x256xf32>
    %cst = arith.constant dense<0.000000e+00> : vector<4x256xf32>
    %14 = tpu.matmul %0, %13, %cst {dimension_numbers = #tpu.dot_dimension_numbers<[1], [0], [0], [1], [0, 0, 1, 1], [], []>} : vector<4x8xf32>, vector<8x256xf32>, vector<4x256xf32> -> vector<4x256xf32>
    %cst_18 = arith.constant dense<0.000000e+00> : vector<16x256xf32>
    %15 = tpu.matmul %1, %14, %cst_18 {dimension_numbers = #tpu.dot_dimension_numbers<[1], [0], [0], [1], [0, 0, 1, 1], [], []>} : vector<16x4xf32>, vector<4x256xf32>, vector<16x256xf32> -> vector<16x256xf32>
    %16 = vector.broadcast %3 : vector<16x1xf32> to vector<16x256xf32>
    %17 = arith.addf %15, %16 : vector<16x256xf32>
    %cst_19 = arith.constant 0.000000e+00 : f32
    %18 = vector.broadcast %cst_19 : f32 to vector<16x256xf32>
    %19 = arith.maximumf %17, %18 : vector<16x256xf32>
    %cst_20 = arith.constant dense<0.000000e+00> : vector<64x256xf32>
    %20 = tpu.matmul %2, %19, %cst_20 {dimension_numbers = #tpu.dot_dimension_numbers<[1], [0], [0], [1], [0, 0, 1, 1], [], []>} : vector<64x16xf32>, vector<16x256xf32>, vector<64x256xf32> -> vector<64x256xf32>
    %21 = vector.broadcast %4 : vector<64x1xf32> to vector<64x256xf32>
    %22 = arith.addf %20, %21 : vector<64x256xf32>
    %cst_21 = arith.constant 0.000000e+00 : f32
    %23 = vector.broadcast %cst_21 : f32 to vector<64x256xf32>
    %24 = arith.maximumf %22, %23 : vector<64x256xf32>
    %c0_22 = arith.constant 0 : index
    %c0_23 = arith.constant 0 : index
    %c0_24 = arith.constant 0 : index
    %25 = vector.load %arg10[%c0_22, %c0_23, %c0_24] : memref<1x64x256xf32, #tpu.memory_space<vmem>>, vector<1x64x256xf32>
    %26 = vector.shape_cast %25 : vector<1x64x256xf32> to vector<64x256xf32>
    %27 = vector.shape_cast %24 : vector<64x256xf32> to vector<1x64x256xf32>
    tpu.vector_store %arg10[%c0_22, %c0_23, %c0_24], %27 {strides = array<i32>} : memref<1x64x256xf32, #tpu.memory_space<vmem>>, vector<1x64x256xf32>,
    return
  }
  func.func @transform_0(%arg0: i32, %arg1: i32) -> (i32, i32, i32) {
    %c0_i32 = arith.constant 0 : i32
    %c0_i32_0 = arith.constant 0 : i32
    return %arg0, %c0_i32, %arg1 : i32, i32, i32
  }
  func.func @transform_1(%arg0: i32, %arg1: i32) -> (i32, i32, i32) {
    %c0_i32 = arith.constant 0 : i32
    %c0_i32_0 = arith.constant 0 : i32
    return %arg0, %c0_i32, %arg1 : i32, i32, i32
  }
  func.func @transform_2(%arg0: i32, %arg1: i32) -> (i32, i32, i32) {
    %c0_i32 = arith.constant 0 : i32
    %c0_i32_0 = arith.constant 0 : i32
    %c0_i32_1 = arith.constant 0 : i32
    return %arg0, %c0_i32, %c0_i32_0 : i32, i32, i32
  }
  func.func @transform_3(%arg0: i32, %arg1: i32) -> (i32, i32) {
    %c0_i32 = arith.constant 0 : i32
    %c0_i32_0 = arith.constant 0 : i32
    %c0_i32_1 = arith.constant 0 : i32
    return %c0_i32, %c0_i32_0 : i32, i32
  }
  func.func @transform_4(%arg0: i32, %arg1: i32) -> (i32, i32) {
    %c0_i32 = arith.constant 0 : i32
    %c0_i32_0 = arith.constant 0 : i32
    %c0_i32_1 = arith.constant 0 : i32
    return %c0_i32, %c0_i32_0 : i32, i32
  }
  func.func @transform_5(%arg0: i32, %arg1: i32) -> (i32, i32) {
    %c0_i32 = arith.constant 0 : i32
    %c0_i32_0 = arith.constant 0 : i32
    %c0_i32_1 = arith.constant 0 : i32
    return %c0_i32, %c0_i32_0 : i32, i32
  }
  func.func @transform_6(%arg0: i32, %arg1: i32) -> (i32, i32) {
    %c0_i32 = arith.constant 0 : i32
    %c0_i32_0 = arith.constant 0 : i32
    %c0_i32_1 = arith.constant 0 : i32
    return %c0_i32, %c0_i32_0 : i32, i32
  }
  func.func @transform_7(%arg0: i32, %arg1: i32) -> (i32, i32) {
    %c0_i32 = arith.constant 0 : i32
    %c0_i32_0 = arith.constant 0 : i32
    %c0_i32_1 = arith.constant 0 : i32
    return %c0_i32, %c0_i32_0 : i32, i32
  }
  func.func @transform_8(%arg0: i32, %arg1: i32) -> (i32, i32, i32) {
    %c0_i32 = arith.constant 0 : i32
    %c0_i32_0 = arith.constant 0 : i32
    return %arg0, %c0_i32, %arg1 : i32, i32, i32
  }
}

</mosaic_0001>

<bundles_post_ra>
// kernel: decoder_forward_nchw.1
= control target key start
LH: loop header
LB: loop body
LE: loop exit
PB: predicated region body
PF: predicated region fallthrough
CT: control target
= control target key end

     0   :  { %13 = vsyncpa [#allocation3], 0  ;;  %s1144_s27 = smov 0   ;;  %s1146_s28 = smov 0   ;;  %s1332_s0 = inlined_call_operand.vmem [shape: f32[2,8,256], index: 0, kind: input, shape index: {}]   ;;  %s1333_s1 = inlined_call_operand.vmem [shape: f32[2,8,256], index: 1, kind: input, shape index: {}]   ;;  %s1334_s2 = inlined_call_operand.vmem [shape: f32[2,1,1], index: 2, kind: input, shape index: {}]   ;;  %s1335_s3 = inlined_call_operand.hbm [shape: f32[4,8], index: 3, kind: input, shape index: {}]   ;;  %s1336_s4 = inlined_call_operand.vmem [shape: f32[16,4], index: 4, kind: input, shape index: {}]   ;;  %s1337_s5 = inlined_call_operand.vmem [shape: f32[64,16], index: 5, kind: input, shape index: {}]   ;;  %s1338_s6 = inlined_call_operand.vmem [shape: f32[16,1], index: 6, kind: input, shape index: {}]   ;;  %s1339_s7 = inlined_call_operand.vmem [shape: f32[64,1], index: 7, kind: input, shape index: {}]   ;;  %s1340_s8 = inlined_call_operand.vmem [shape: f32[2,64,256], index: 8, kind: output, shape index: {}]  }
   0x1   :  { %s1148_s29 = smov 0  }
   0x2 LB: > { %s963_s30 = sadd.s32 4294967295, %s1094_s29   ;;  %s31_s9 = sadd.s32 1, %s1090_s28  ;;  %s1094_s29 = sphi %s1148_s29, %s19_s29   ;;  %s1090_s28 = sphi %s1146_s28, %s1350_s28   ;;  %s1086_s27 = sphi %s1144_s27, %s1349_s27  }
   0x3   : > { %p33_p0 = scmp.ge.s32.totalorder %s31_s9, 2  ;;  %p965_p1 = scmp.ge.s32.totalorder %s1094_s29, 1 }
   0x4   : > { %p251_p2 = scmp.lt.s32.totalorder %s1094_s29, 3  ;;  %p1169_p4 = scmp.eq.s32.totalorder %s963_s30, 0 }
   0x5   : > { %s1352_s9 = smov (%p33_p0, %s31_s9), 0  ;;  %s1096_s12 = smov [#allocation2]  }
   0x6   : > { %p1165_p3 = pnand %p965_p1, %p251_p2  ;;  %s264_s13 = sshll.u32 %s1096_s12, 4  ;;  %s265_s13 = int_to_ptr.vmem [resolvable:$true] %s264_s13 }
   0x7   : > { %s1345_s11 = scalar_select %p1169_p4, 1, 0 }
   0x8   : > { %s1344_s10 = scalar_select %p1165_p3, 1, 0 }
   0x9   : > { %p1005_p5 = pneg %p1165_p3  ;;  %s1040_s17 = scalar_lea.hbm %s1335_s3, 64 }
   0xa   : > { %p1041_p7 = scmp.ne.s32.totalorder %s1335_s3, %s1040_s17  ;;  %p1047_p11 = scmp.lt.u32.totalorder %s1040_s17, %s1335_s3 }
   0xb   : > { %p1177_p6 = pnand %p1169_p4, %p1005_p5 }
   0xd   : > { %p1042_p8 = pneg %p1177_p6 }
   0xf   : > { %p1043_p9 = pnand %p1042_p8, %p1041_p7 }
  0x11   : > { %p1044_p10 = pneg %p1043_p9 }
  0x13   : > { %p1049_p12 = pnand %p1047_p11, %p1044_p10 }
  0x15   : > { %1052 = shalt.err (!%p1049_p12)
}
  0x16   : > { %s1053_s22 = scalar_lea.vmem %s265_s13, 64  ;;  %p1061_p2 = scmp.lt.s32.totalorder %s265_s13, %s265_s13 }
  0x17   : > { %p1054_p13 = scmp.ne.s32.totalorder %s265_s13, %s1053_s22  ;;  %p1062_p5 = scmp.lt.s32.totalorder %s1053_s22, %s1053_s22 }
  0x19   : > { %p1056_p0 = pnand %p1054_p13, %p1042_p8  ;;  %p1063_p4 = por %p1062_p5, %p1061_p2 }
  0x1b   : > { %p1057_p1 = pneg %p1056_p0 }
  0x1d   : > { %p1064_p3 = pnand %p1063_p4, %p1057_p1 }
  0x1f   : > { %1067 = shalt.err (!%p1064_p3)
}
  0x20   : > { %1008 = dma.hbm_to_vmem [thread:$0]  (!%p1177_p6), %s1335_s3, 64, %s265_s13, [#allocation3]  }
  0x21   : > { %p1347_p7 = scmp.ne.s32.totalorder %s1344_s10, 0 }
  0x22   : > { %p1348_p9 = scmp.ne.s32.totalorder (!%p1347_p7), %s1345_s11, 0 }
  0x23   : > { %321 = sbr.rel (%p1347_p7) target bundleno = 858 (0x35a), region = 52 }
  0x2a   : > { %1081 = dma.done.wait (%p1348_p9), [#allocation3], 64  }
  0x2b   : > { %1083 = vsyncadd (%p1348_p9), [#allocation3], 4294967232  ;;  %p376_p8 = scmp.lt.s32.totalorder %s1086_s27, 1  ;;  %v1097_v0 = vmov 0   ;;  %v419_v2 = vld [vmem:[%s1338_s6] sm:$0xff]  ;;  %v422_v3 = vld [vmem:[%s1339_s7 + $0x8] sm:$0xff] }
  0x2c   : > { %1038 = vset.pattern.permute.xlu0 %v1097_v0  ;;  %1039 = vset.pattern.permute.xlu1 %v1097_v0  ;;  %v1098_v4 = vmov 0.0   ;;  %v424_v5 = vld [vmem:[%s1339_s7 + $0x18] sm:$0xff]  ;;  %v426_v6 = vld [vmem:[%s1339_s7 + $0x28] sm:$0xff]  ;;  %v408_v17 = vld [vmem:[#allocation2] sm:$0xf]  ;;  %vm447_vm0 = vcmask 64512  }
  0x2d   : > { %s1354_s27 = smov (!%p376_p8, %s1086_s27), 1  ;;  %515 = vmatprep.mubr.f32.mxu0 %v1098_v4  ;;  %610 = vmatprep.mubr.f32.mxu1 %v1098_v4  ;;  %v428_v7 = vld [vmem:[%s1339_s7 + $0x38] sm:$0xff]  ;;  %v420_v18 = vld [vmem:[%s1338_s6 + $0x8] sm:$0xff]  ;;  %v421_v19 = vld [vmem:[%s1339_s7] sm:$0xff]  ;;  %vm539_vm1 = vcmask 1043456   ;;  %vm532_vm2 = vcmask 31744  }
  0x2e   : > { %s397_s30 = scalar_lea.vmem %s1334_s2, %s1354_s27  ;;  %s992_s20 = sshll.u32 %s1354_s27, 4  ;;  %529 = vperm.xlu1 %1039, %v420_v18   ;;  %v423_v20 = vld [vmem:[%s1339_s7 + $0x10] sm:$0xff]  ;;  %v425_v21 = vld [vmem:[%s1339_s7 + $0x20] sm:$0xff]  ;;  %v410_v26 = vld [vmem:[%s1336_s4 + $0x8] sm:$0xff]  ;;  %vm667_vm3 = vcmask 130048  }
  0x2f   : > { %v976_v1 = vld [vmem:[%s397_s30] ss:$0 sm:$0xff]  ;;  %s393_s23 = scalar_lea.vmem %s1333_s1, %s992_s20  ;;  %s383_s26 = scalar_lea.vmem %s1332_s0, %s992_s20  ;;  %v427_v22 = vld [vmem:[%s1339_s7 + $0x30] sm:$0xff]  ;;  %v416_v44 = vld [vmem:[%s1337_s5 + $0x28] sm:$0xff] }
  0x30   : > { %440 = vperm.xlu0 %1038, %v976_v1   ;;  %v431_v8 = vld [vmem:[%s393_s23] sm:$0xff]  ;;  %v432_v9 = vld [vmem:[%s393_s23 + $0x8] sm:$0xff]  ;;  %v417_v46 = vld [vmem:[%s1337_s5 + $0x30] sm:$0xff]  ;;  %s994_s21 = sshll.u32 %s1354_s27, 7 }
  0x31   : > { %v430_v11 = vld [vmem:[%s383_s26 + $0x8] sm:$0xff]  ;;  %v429_v12 = vld [vmem:[%s383_s26] sm:$0xff]  ;;  %v413_v47 = vld [vmem:[%s1337_s5 + $0x10] sm:$0xff]  ;;  %s1303_s24 = scalar_lea.vmem %s1340_s8, %s994_s21 }
  0x32   : > { %629 = vperm.xlu1 %1039, %v421_v19   ;;  %v409_v25 = vld [vmem:[%s1336_s4] sm:$0xff]  ;;  %v412_v45 = vld [vmem:[%s1337_s5 + $0x8] sm:$0xff]  ;;  %v418_v48 = vld [vmem:[%s1337_s5 + $0x38] sm:$0xff] }
  0x33   : > { %v411_v43 = vld [vmem:[%s1337_s5] sm:$0xff]  ;;  %v414_v49 = vld [vmem:[%s1337_s5 + $0x18] sm:$0xff] }
  0x34   : > { %524 = vperm.xlu0 %1038, %v419_v2   ;;  %v415_v50 = vld [vmem:[%s1337_s5 + $0x20] sm:$0xff] }
  0x36   : > { %639 = vperm.xlu1 %1039, %v423_v20  }
  0x38   : > { %634 = vperm.xlu0 %1038, %v422_v3  }
  0x3a   : > { %649 = vperm.xlu1 %1039, %v425_v21  }
  0x3c   : > { %644 = vperm.xlu0 %1038, %v424_v5  }
  0x3e   : > { %659 = vperm.xlu1 %1039, %v427_v22  }
  0x40   : > { %654 = vperm.xlu0 %1038, %v426_v6  }
  0x44   : > { %664 = vperm.xlu0 %1038, %v428_v7  }
  0xad   : > { %v530_v31 = vpop.permute.xlu1 %529 }
  0xaf   : > { %v441_v10 = vpop.permute.xlu0 %440 }
  0xb0   : > { %v443_v13 = vmul.f32 %v441_v10, %v431_v8  ;;  %v444_v14 = vmul.f32 %v441_v10, %v432_v9 }
  0xb1   : > { %v630_v51 = vpop.permute.xlu1 %629 }
  0xb2   : > { %v446_v15 = vadd.f32 %v444_v14, %v430_v11  ;;  %v445_v16 = vadd.f32 %v443_v13, %v429_v12 }
  0xb3   : > { %v525_v29 = vpop.permute.xlu0 %524 }
  0xb4   : > { %451 = vmatprep.subr.mxu0 %v446_v15 }
  0xb5   : > { %452 = vmatpush1.msra.mxu0 %v445_v16  ;;  %v640_v53 = vpop.permute.xlu1 %639 }
  0xb6   : > { %977 = vmatmul.mubr.msk.f32.vlgmr.msra.gmra.mrb[0].mxu0 %vm447_vm0, %v408_v17 }
  0xb7   : > { %756 = vmatprep.mubr.f32.mxu0 %v1098_v4  ;;  %v635_v52 = vpop.permute.xlu0 %634 }
  0xb9   : > { %v1297_v55 = vpop.permute.xlu1 %649 }
  0xbb   : > { %v645_v54 = vpop.permute.xlu0 %644 }
  0xbd   : > { %v660_v1 = vpop.permute.xlu1 %659 }
  0xbf   : > { %v655_v56 = vpop.permute.xlu0 %654 }
  0xc3   : > { %v665_v14 = vpop.permute.xlu0 %664 }
 0x189   : > { %v517_v23 = vpop.f32.mrb[0].mxu0 }
 0x18a   : > { %v519_v24 = vpop.f32.mrb[1].mxu0 }
 0x18b   : > { %978 = vmatprep.subr.msk.mxu1 %vm539_vm1, %v519_v24 }
 0x18c   : > { %979 = vmatpush1.msk.msra.mxu1 %vm539_vm1, %v517_v23 }
 0x18d   : > { %980 = vmatmul.mubr.msk.f32.vlgmr.msra.gmra.mrb[0].mxu1 %vm532_vm2, %v409_v25 }
 0x18e   : > { %616 = vmatprep.mubr.f32.mxu1 %v1098_v4 }
 0x191   : > { %981 = vmatmul.mubr.msk.f32.gmra.mrb[2].mxu1 %vm532_vm2, %v410_v26 }
 0x192   : > { %786 = vmatprep.mubr.f32.mxu1 %v1098_v4 }
 0x260   : > { %v612_v27 = vpop.f32.mrb[0].mxu1 }
 0x261   : > { %v614_v28 = vpop.f32.mrb[1].mxu1  ;;  %v613_v30 = vadd.f32 %v612_v27, %v525_v29 }
 0x262   : > { %v615_v32 = vadd.f32 %v614_v28, %v525_v29 }
 0x263   : > { %v623_v37 = vmax.f32 %v613_v30, 0.0 }
 0x264   : > { %v618_v33 = vpop.f32.mrb[2].mxu1  ;;  %v624_v39 = vmax.f32 %v615_v32, 0.0 }
 0x265   : > { %v619_v34 = vadd.f32 %v618_v33, %v530_v31  ;;  %v620_v35 = vpop.f32.mrb[3].mxu1 }
 0x266   : > { %v621_v36 = vadd.f32 %v620_v35, %v530_v31 }
 0x267   : > { %v625_v38 = vmax.f32 %v619_v34, 0.0 }
 0x268   : > { %v626_v40 = vmax.f32 %v621_v36, 0.0 }
 0x269   : > { %v997_v41 = vpack.c.bf16 %v625_v38, %v623_v37 }
 0x26a   : > { %v995_v42 = vpack.c.bf16 %v626_v40, %v624_v39 }
 0x26c   : > { %996 = vmatprep.subr.bf16.mxu0 %v995_v42  ;;  %999 = vmatprep.subr.bf16.mxu1 %v995_v42 }
 0x26d   : > { %998 = vmatpush1.bf16.msra.mxu0 %v997_v41  ;;  %1000 = vmatpush1.bf16.msra.mxu1 %v997_v41 }
 0x270   : > { %982 = vmatmul.mubr.msk.f32.vlgmr.msra.gmra.mrb[2].mxu0 %vm667_vm3, %v411_v43  ;;  %987 = vmatmul.mubr.msk.f32.vlgmr.msra.gmra.mrb[4].mxu1 %vm667_vm3, %v416_v44 }
 0x271   : > { %762 = vmatprep.mubr.f32.mxu0 %v1098_v4  ;;  %792 = vmatprep.mubr.f32.mxu1 %v1098_v4 }
 0x274   : > { %983 = vmatmul.mubr.msk.f32.gmra.mrb[4].mxu0 %vm667_vm3, %v412_v45  ;;  %988 = vmatmul.mubr.msk.f32.gmra.mrb[6].mxu1 %vm667_vm3, %v417_v46 }
 0x275   : > { %768 = vmatprep.mubr.f32.mxu0 %v1098_v4  ;;  %798 = vmatprep.mubr.f32.mxu1 %v1098_v4 }
 0x278   : > { %984 = vmatmul.mubr.msk.f32.gmra.mrb[6].mxu0 %vm667_vm3, %v413_v47  ;;  %989 = vmatmul.mubr.msk.f32.gmra.mrb[8].mxu1 %vm667_vm3, %v418_v48 }
 0x279   : > { %774 = vmatprep.mubr.f32.mxu0 %v1098_v4 }
 0x27c   : > { %985 = vmatmul.mubr.msk.f32.gmra.mrb[8].mxu0 %vm667_vm3, %v414_v49 }
 0x27d   : > { %780 = vmatprep.mubr.f32.mxu0 %v1098_v4 }
 0x280   : > { %986 = vmatmul.mubr.msk.f32.gmra.mrb[10].mxu0 %vm667_vm3, %v415_v50 }
 0x343   : > { %v758_v57 = vpop.f32.mrb[2].mxu0  ;;  %v788_v58 = vpop.f32.mrb[4].mxu1 }
 0x344   : > { %v759_v59 = vadd.f32 %v758_v57, %v630_v51  ;;  %v789_v60 = vadd.f32 %v788_v58, %v655_v56  ;;  %v760_v61 = vpop.f32.mrb[3].mxu0  ;;  %v790_v62 = vpop.f32.mrb[5].mxu1 }
 0x345   : > { %v761_v63 = vadd.f32 %v760_v61, %v630_v51  ;;  %v791_v0 = vadd.f32 %v790_v62, %v655_v56 }
 0x346   : > { %v805_v2 = vmax.f32 %v759_v59, 0.0  ;;  %v815_v3 = vmax.f32 %v789_v60, 0.0 }
 0x347   : > { %v806_v4 = vmax.f32 %v761_v63, 0.0  ;;  %v816_v5 = vmax.f32 %v791_v0, 0.0  ;;  %v764_v6 = vpop.f32.mrb[4].mxu0  ;;  %v794_v7 = vpop.f32.mrb[6].mxu1 }
 0x348   : > { %821 = vst [vmem:[%s1303_s24] sm:$0xff] %v805_v2  ;;  %831 = vst [vmem:[%s1303_s24 + $0x50] sm:$0xff] %v815_v3  ;;  %v765_v8 = vadd.f32 %v764_v6, %v635_v52  ;;  %v795_v9 = vadd.f32 %v794_v7, %v660_v1  ;;  %v766_v10 = vpop.f32.mrb[5].mxu0  ;;  %v796_v11 = vpop.f32.mrb[7].mxu1 }
 0x349   : > { %822 = vst [vmem:[%s1303_s24 + $0x8] sm:$0xff] %v806_v4  ;;  %832 = vst [vmem:[%s1303_s24 + $0x58] sm:$0xff] %v816_v5  ;;  %v767_v12 = vadd.f32 %v766_v10, %v635_v52  ;;  %v797_v13 = vadd.f32 %v796_v11, %v660_v1 }
 0x34a   : > { %v807_v15 = vmax.f32 %v765_v8, 0.0  ;;  %v817_v16 = vmax.f32 %v795_v9, 0.0 }
 0x34b   : > { %v808_v17 = vmax.f32 %v767_v12, 0.0  ;;  %v818_v18 = vmax.f32 %v797_v13, 0.0  ;;  %v770_v19 = vpop.f32.mrb[6].mxu0  ;;  %v800_v20 = vpop.f32.mrb[8].mxu1 }
 0x34c   : > { %823 = vst [vmem:[%s1303_s24 + $0x10] sm:$0xff] %v807_v15  ;;  %833 = vst [vmem:[%s1303_s24 + $0x60] sm:$0xff] %v817_v16  ;;  %v771_v21 = vadd.f32 %v770_v19, %v640_v53  ;;  %v801_v22 = vadd.f32 %v800_v20, %v665_v14  ;;  %v772_v23 = vpop.f32.mrb[7].mxu0  ;;  %v802_v24 = vpop.f32.mrb[9].mxu1 }
 0x34d   : > { %824 = vst [vmem:[%s1303_s24 + $0x18] sm:$0xff] %v808_v17  ;;  %834 = vst [vmem:[%s1303_s24 + $0x68] sm:$0xff] %v818_v18  ;;  %v773_v25 = vadd.f32 %v772_v23, %v640_v53  ;;  %v803_v26 = vadd.f32 %v802_v24, %v665_v14 }
 0x34e   : > { %v809_v27 = vmax.f32 %v771_v21, 0.0  ;;  %v819_v28 = vmax.f32 %v801_v22, 0.0 }
 0x34f   : > { %v810_v29 = vmax.f32 %v773_v25, 0.0  ;;  %v820_v30 = vmax.f32 %v803_v26, 0.0  ;;  %v776_v31 = vpop.f32.mrb[8].mxu0 }
 0x350   : > { %825 = vst [vmem:[%s1303_s24 + $0x20] sm:$0xff] %v809_v27  ;;  %835 = vst [vmem:[%s1303_s24 + $0x70] sm:$0xff] %v819_v28  ;;  %v777_v32 = vadd.f32 %v776_v31, %v645_v54  ;;  %v778_v33 = vpop.f32.mrb[9].mxu0 }
 0x351   : > { %826 = vst [vmem:[%s1303_s24 + $0x28] sm:$0xff] %v810_v29  ;;  %836 = vst [vmem:[%s1303_s24 + $0x78] sm:$0xff] %v820_v30  ;;  %v779_v34 = vadd.f32 %v778_v33, %v645_v54 }
 0x352   : > { %v811_v35 = vmax.f32 %v777_v32, 0.0 }
 0x353   : > { %v812_v36 = vmax.f32 %v779_v34, 0.0  ;;  %v782_v37 = vpop.f32.mrb[10].mxu0 }
 0x354   : > { %827 = vst [vmem:[%s1303_s24 + $0x30] sm:$0xff] %v811_v35  ;;  %v783_v38 = vadd.f32 %v782_v37, %v1297_v55  ;;  %v784_v39 = vpop.f32.mrb[11].mxu0 }
 0x355   : > { %828 = vst [vmem:[%s1303_s24 + $0x38] sm:$0xff] %v812_v36  ;;  %v785_v40 = vadd.f32 %v784_v39, %v1297_v55 }
 0x356   : > { %v813_v41 = vmax.f32 %v783_v38, 0.0 }
 0x357   : > { %v814_v42 = vmax.f32 %v785_v40, 0.0 }
 0x358   : > { %829 = vst [vmem:[%s1303_s24 + $0x40] sm:$0xff] %v813_v41 }
 0x359   : > { %830 = vst [vmem:[%s1303_s24 + $0x48] sm:$0xff] %v814_v42 }
 0x35a PF: > { %s19_s29 = sadd.s32 1, %s1094_s29   ;;  %s1349_s27 = smov %s1090_s28 }
 0x35b   : > { %p16_p3 = scmp.ge.s32.totalorder %s19_s29, 4   ;;  %s1350_s28 = smov %s1352_s9 }
 0x35d   :  { %18 = sbr.rel (!%p16_p3) target bundleno = 2 (0x2), region = 93 }
 0x364   :  { %867 = vsyncpa [#allocation3], 1 }
 0x365   :  { %869 = vsyncpa [#allocation3 + $0x1], 1 }

</bundles_post_ra>
